<compile_context>
chip_gen: v7x
topology: tpu7x:2x2x1
jax: 0.10.0
libtpu: 0.0.40
codegen_flags: <defaults>
</compile_context>

<pallas_src>
import math
from functools import partial

import jax
import jax.numpy as jnp
from jax.experimental import pallas as pl
from jax.experimental.pallas import tpu as pltpu


# ---------------------------------------------------------------------------
# Kernels. Hot path: exp on EUP, mul/add on VPU, (tiny, exact) MXU dot.
# ---------------------------------------------------------------------------

def _mod_kernel_seq_major(t_ref, nd_ref, x_ref, o_ref, *, shift):
    # x/o: (TL, D), t: (TL, 1), nd = -|deltas|: (1, D)
    decay = jnp.exp(t_ref[...] * nd_ref[...])                      # (TL, D)
    o_ref[...] = (x_ref[...] * (decay + shift)).astype(o_ref.dtype)


def _mod_kernel_packed(t_ref, e_ref, nd_ref, x_ref, o_ref, *, shift):
    # Lane-packed small-D path: each row of x packs k = 128//D consecutive
    # time steps of D channels.
    #   x/o: (TL, 128), t: (TL, kp), e: (kp, 128) 0/1 repeat matrix,
    #   nd:  (1, 128) = tile(-|deltas|, k)
    # HIGHEST-precision matmul against a 0/1 matrix is a bit-exact lane
    # expansion of t (t*1.0 plus exact zeros); MXU has full slack here.
    t_exp = jnp.dot(t_ref[...], e_ref[...],
                    precision=jax.lax.Precision.HIGHEST,
                    preferred_element_type=jnp.float32)            # (TL, 128)
    decay = jnp.exp(t_exp * nd_ref[...])
    o_ref[...] = (x_ref[...] * (decay + shift)).astype(o_ref.dtype)


# ---------------------------------------------------------------------------
# Wrapper
# ---------------------------------------------------------------------------

def _pick_tile(rows, row_bytes, target_bytes, mult):
    """Largest row-tile (multiple of `mult`) within the byte budget, or the
    full row count (single block) if the budget covers it."""
    tl = max(mult, (target_bytes // max(row_bytes, 1)) // mult * mult)
    return rows if tl >= rows else tl


def exponential_modulation(t, x, deltas, *, shift=0.05, modulate=True,
                           tile_target_bytes=4 * 1024 * 1024,
                           use_core_parallel=False):
    """JAX/Pallas equivalent of ExponentialModulation.forward(t, x).

    t: (1, L, 1) float32   x: (1, L, D)   deltas: (1, 1, D)
    Returns (1, L, D) in x's dtype.

    The pallas_call aliases its output onto the x operand (a free reshape
    view of the caller's x).  Donate x at the caller's jit boundary for a
    true in-place update; otherwise XLA inserts one defensive copy.
    use_core_parallel=True shards tiles across both TensorCores on v7x.
    """
    if not modulate:
        return x

    B, L, D = x.shape
    assert B == 1, "Hyena window function operates on a single (L, D) filter"

    tvec = t.reshape(L).astype(jnp.float32)
    neg_abs = (-jnp.abs(deltas.reshape(D))).astype(jnp.float32)    # hoisted
    itemsize = jnp.dtype(x.dtype).itemsize
    mult = max(8, 32 // itemsize)       # sublane rounding: f32 8, bf16 16, i8 32

    dim_sem = (pltpu.CORE_PARALLEL,) if use_core_parallel else ("parallel",)
    cparams = pltpu.CompilerParams(
        dimension_semantics=dim_sem,
        vmem_limit_bytes=40 * 1024 * 1024)   # ~4x tile working set, all gens
    cost = pl.CostEstimate(
        flops=3 * L * D,
        transcendentals=L * D,
        bytes_accessed=2 * L * D * itemsize + 4 * (L + D))

    k = 128 // D if (0 < D < 128 and 128 % D == 0) else 0
    if k and L % k == 0:
        # ---- Lane-packed path: free reshape (L, D) -> (L//k, 128). --------
        rows, width = L // k, 128
        kp = max(k, 8)                      # pad contraction dim to >=8 rows
        TL = _pick_tile(rows, width * itemsize, tile_target_bytes, mult)

        x2 = x.reshape(rows, width)                       # free row-major view
        t2 = tvec.reshape(rows, k)
        if kp != k:
            t2 = jnp.pad(t2, ((0, 0), (0, kp - k)))       # t is tiny (L floats)
        e = (jnp.arange(128)[None, :] // D ==
             jnp.arange(kp)[:, None]).astype(jnp.float32)     # (kp, 128)
        ndt = jnp.tile(neg_abs, k)[None, :]               # (1, 128)

        out2 = pl.pallas_call(
            partial(_mod_kernel_packed, shift=shift),
            out_shape=jax.ShapeDtypeStruct((rows, width), x.dtype),
            grid=(pl.cdiv(rows, TL),),
            in_specs=[
                pl.BlockSpec((TL, kp), lambda i: (i, 0)),      # t (packed rows)
                pl.BlockSpec((kp, 128), lambda i: (0, 0)),     # repeat matrix
                pl.BlockSpec((1, 128), lambda i: (0, 0)),      # tiled -|deltas|
                pl.BlockSpec((TL, width), lambda i: (i, 0)),   # x
            ],
            out_specs=pl.BlockSpec((TL, width), lambda i: (i, 0)),
            input_output_aliases={3: 0},                       # out aliases x
            compiler_params=cparams,
            cost_estimate=cost,
        )(t2, e, ndt, x2)
    else:
        # ---- Natural seq-major layout (L, D); lane-dense iff D % 128 == 0,
        #      masked stores otherwise (still no extra HBM passes). ---------
        TL = _pick_tile(L, D * itemsize, tile_target_bytes, mult)
        x2 = x.reshape(L, D)                               # free view
        t2 = tvec[:, None]                                 # (L, 1)
        d2 = neg_abs[None, :]                              # (1, D)

        out2 = pl.pallas_call(
            partial(_mod_kernel_seq_major, shift=shift),
            out_shape=jax.ShapeDtypeStruct((L, D), x.dtype),
            grid=(pl.cdiv(L, TL),),
            in_specs=[
                pl.BlockSpec((TL, 1), lambda i: (i, 0)),       # t
                pl.BlockSpec((1, D), lambda i: (0, 0)),        # -|deltas|
                pl.BlockSpec((TL, D), lambda i: (i, 0)),       # x
            ],
            out_specs=pl.BlockSpec((TL, D), lambda i: (i, 0)),
            input_output_aliases={2: 0},                       # out aliases x
            compiler_params=cparams,
            cost_estimate=cost,
        )(t2, d2, x2)

    return out2.reshape(1, L, D)


def make_deltas(d_model, fast_decay_pct=0.3, slow_decay_pct=1.5, target=0.01):
    """Deterministic parameter init, matching the PyTorch __init__."""
    max_decay = math.log(target) / fast_decay_pct
    min_decay = math.log(target) / slow_decay_pct
    deltas = jnp.linspace(min_decay, max_decay, d_model, dtype=jnp.float32)
    return deltas[None, None]          # (1, 1, D)


def _reference(t, x, deltas, shift):
    return x * (jnp.exp(-t * jnp.abs(deltas)) + shift)


_exponential_modulation = jax.jit(
    exponential_modulation,
    static_argnames=("shift", "modulate", "tile_target_bytes",
                     "use_core_parallel"))


if __name__ == "__main__":
    shift = 0.05
    key = jax.random.PRNGKey(0)

    # (d_model, seq_len, dtype, tile_target_bytes, atol, rtol)
    cases = [
        (32, 8, jnp.float32, 4 * 1024 * 1024, 1e-5, 1e-5),   # packed, 1 block
        (128, 520, jnp.float32, 64 * 1024, 1e-5, 1e-5),      # seq-major, ragged tail
        (32, 300, jnp.float32, 32 * 1024, 1e-5, 1e-5),       # packed, ragged tail
        (40, 100, jnp.float32, 16 * 1024, 1e-5, 1e-5),       # masked-store fallback
        (256, 333, jnp.bfloat16, 64 * 1024, 1e-2, 1e-2),     # bf16, 16-row rounding
    ]

    for d_model, seq_len, dtype, target_bytes, atol, rtol in cases:
        key, kx = jax.random.split(key)
        t = jnp.linspace(0.0, 1.0, seq_len, endpoint=False,
                         dtype=jnp.float32)[None, :, None]              # (1, L, 1)
        x = jax.random.normal(kx, (1, seq_len, d_model),
                              jnp.float32).astype(dtype)                # (1, L, D)
        deltas = make_deltas(d_model)                                   # (1, 1, D)

        out = _exponential_modulation(t, x, deltas, shift=shift,
                                      tile_target_bytes=target_bytes)
        out = jax.block_until_ready(out)

        ref = _reference(t, x.astype(jnp.float32), deltas, shift)
        assert out.shape == x.shape and out.dtype == x.dtype
        assert jnp.allclose(out.astype(jnp.float32), ref, atol=atol, rtol=rtol), \
            f"mismatch for D={d_model}, L={seq_len}, dtype={dtype}"

    print("KERNEL_OK")
</pallas_src>

<mosaic_0001>
module attributes {stable_mosaic.version = 11 : i64} {
  func.func @_mod_kernel_packed(%arg0: i32, %arg1: memref<2x8xf32, #tpu.memory_space<vmem>>, %arg2: memref<8x128xf32, #tpu.memory_space<vmem>>, %arg3: memref<1x128xf32, #tpu.memory_space<vmem>>, %arg4: memref<2x128xf32, #tpu.memory_space<vmem>>, %arg5: memref<2x128xf32, #tpu.memory_space<vmem>>) attributes {dimension_semantics = [#tpu.dimension_semantics<parallel>], iteration_bounds = array<i64: 1>, scalar_prefetch = 0 : i64, scratch_operands = 0 : i64, tpu.core_type = #tpu.core_type<tc>, window_params = [{transform_indices = @transform_0, window_bounds = array<i64: 2, 8>}, {pipeline_mode = #tpu.pipeline_mode<synchronous>, transform_indices = @transform_1, window_bounds = array<i64: 8, 128>}, {pipeline_mode = #tpu.pipeline_mode<synchronous>, transform_indices = @transform_2, window_bounds = array<i64: 1, 128>}, {transform_indices = @transform_3, window_bounds = array<i64: 2, 128>}, {transform_indices = @transform_4, window_bounds = array<i64: 2, 128>}]} {
    %c0 = arith.constant 0 : index
    %c0_0 = arith.constant 0 : index
    %0 = vector.load %arg1[%c0, %c0_0] : memref<2x8xf32, #tpu.memory_space<vmem>>, vector<2x8xf32>
    %c0_1 = arith.constant 0 : index
    %c0_2 = arith.constant 0 : index
    %1 = vector.load %arg2[%c0_1, %c0_2] : memref<8x128xf32, #tpu.memory_space<vmem>>, vector<8x128xf32>
    %cst = arith.constant dense<0.000000e+00> : vector<2x128xf32>
    %2 = tpu.matmul %0, %1, %cst {dimension_numbers = #tpu.dot_dimension_numbers<[1], [0], [0], [1], [0, 0, 1, 1], [], []>, precision = #tpu.contract_precision<fp32>} : vector<2x8xf32>, vector<8x128xf32>, vector<2x128xf32> -> vector<2x128xf32>
    %c0_3 = arith.constant 0 : index
    %c0_4 = arith.constant 0 : index
    %3 = vector.load %arg3[%c0_3, %c0_4] : memref<1x128xf32, #tpu.memory_space<vmem>>, vector<1x128xf32>
    %4 = vector.broadcast %3 : vector<1x128xf32> to vector<2x128xf32>
    %5 = arith.mulf %2, %4 : vector<2x128xf32>
    %6 = math.exp %5 : vector<2x128xf32>
    %c0_5 = arith.constant 0 : index
    %c0_6 = arith.constant 0 : index
    %7 = vector.load %arg4[%c0_5, %c0_6] : memref<2x128xf32, #tpu.memory_space<vmem>>, vector<2x128xf32>
    %cst_7 = arith.constant 5.000000e-02 : f32
    %8 = vector.broadcast %cst_7 : f32 to vector<2x128xf32>
    %9 = arith.addf %6, %8 : vector<2x128xf32>
    %10 = arith.mulf %7, %9 : vector<2x128xf32>
    %c0_8 = arith.constant 0 : index
    %c0_9 = arith.constant 0 : index
    %11 = vector.load %arg5[%c0_8, %c0_9] : memref<2x128xf32, #tpu.memory_space<vmem>>, vector<2x128xf32>
    tpu.vector_store %arg5[%c0_8, %c0_9], %10 {strides = array<i32>} : memref<2x128xf32, #tpu.memory_space<vmem>>, vector<2x128xf32>,
    return
  }
  func.func @transform_0(%arg0: i32) -> (i32, i32) {
    %c0_i32 = arith.constant 0 : i32
    %c0_i32_0 = arith.constant 0 : i32
    return %arg0, %c0_i32 : i32, i32
  }
  func.func @transform_1(%arg0: i32) -> (i32, i32) {
    %c0_i32 = arith.constant 0 : i32
    %c0_i32_0 = arith.constant 0 : i32
    %c0_i32_1 = arith.constant 0 : i32
    return %c0_i32, %c0_i32_0 : i32, i32
  }
  func.func @transform_2(%arg0: i32) -> (i32, i32) {
    %c0_i32 = arith.constant 0 : i32
    %c0_i32_0 = arith.constant 0 : i32
    %c0_i32_1 = arith.constant 0 : i32
    return %c0_i32, %c0_i32_0 : i32, i32
  }
  func.func @transform_3(%arg0: i32) -> (i32, i32) {
    %c0_i32 = arith.constant 0 : i32
    %c0_i32_0 = arith.constant 0 : i32
    return %arg0, %c0_i32 : i32, i32
  }
  func.func @transform_4(%arg0: i32) -> (i32, i32) {
    %c0_i32 = arith.constant 0 : i32
    %c0_i32_0 = arith.constant 0 : i32
    return %arg0, %c0_i32 : i32, i32
  }
}

</mosaic_0001>

<bundles_post_ra>
// kernel: tile.8
= control target key start
LH: loop header
LB: loop body
LE: loop exit
PB: predicated region body
PF: predicated region fallthrough
CT: control target
= control target key end

     0   :  { %s22_s0 = inlined_call_operand.vmem [shape: f32[32], index: 0, kind: input, shape index: {}]   ;;  %s23_s1 = inlined_call_operand.vmem [shape: f32[4,32], index: 1, kind: output, shape index: {}]  }
   0x1   :  { %v4_v0 = vld [vmem:[%s22_s0] ss:$0 sm:$0xff] }
   0x2   :  { %5 = vst [vmem:[%s23_s1] sm:$0xf] %v4_v0 }

// kernel: tile.9
= control target key start
LH: loop header
LB: loop body
LE: loop exit
PB: predicated region body
PF: predicated region fallthrough
CT: control target
= control target key end

     0   :  { %vm7_vm0 = vcmask 261120   ;;  %s37_s8 = smov 32   ;;  %s38_s9 = smov 64   ;;  %vm13_vm1 = vcmask 1048320   ;;  %vm19_vm2 = vcmask 785920   ;;  %vm25_vm3 = vcmask 523520   ;;  %s55_s0 = inlined_call_operand.vmem [shape: f32[4,32], index: 0, kind: input, shape index: {}]   ;;  %s56_s1 = inlined_call_operand.vmem [shape: f32[1,128], index: 1, kind: output, shape index: {}]  }
   0x1   :  { %v4_v0 = vld [vmem:[%s55_s0] sm:$0xf]  ;;  %s36_s0 = smov 96  }
   0x2   :  { %5 = vst [vmem:[#allocation1] sm:$0xf] %v4_v0 }
   0x9   :  { %v10_v1 = vld [vmem:[#allocation1 + $0x3] sm:$0x1]   ;;  %v22_v2 = vld [vmem:[#allocation1 + $0x1] sm:$0x1]   ;;  %v6_v3 = vld [vmem:[#allocation1] sm:$0x1]  }
   0xa   :  { %11 = vrot.lane.b32.xlu0 %v10_v1, %s36_s0  ;;  %23 = vrot.lane.b32.xlu1 %v22_v2, %s37_s8  ;;  %v16_v4 = vld [vmem:[#allocation1 + $0x2] sm:$0x1]   ;;  %8 = vst.msk [vmem:[#allocation0] sm:$0x1] %vm7_vm0, %v6_v3  }
   0xe   :  { %17 = vrot.lane.b32.xlu0 %v16_v4, %s38_s9 }
  0x7c   :  { %v12_v5 = vpop.permute.xlu0 %11   ;;  %v24_v6 = vpop.permute.xlu1 %23  }
  0x7d   :  { %14 = vst.msk [vmem:[#allocation0] sm:$0x1] %vm13_vm1, %v12_v5  }
  0x80   :  { %v18_v7 = vpop.permute.xlu0 %17  }
  0x81   :  { %20 = vst.msk [vmem:[#allocation0] sm:$0x1] %vm19_vm2, %v18_v7  }
  0x82   :  { %26 = vst.msk [vmem:[#allocation0] sm:$0x1] %vm25_vm3, %v24_v6  }
  0x89   :  { %v30_v8 = vld [vmem:[#allocation0] sm:$0x1] }
  0x8a   :  { %32 = vst [vmem:[%s56_s1] sm:$0x1] %v30_v8 }

// kernel: exponential_modulation.1
= control target key start
LH: loop header
LB: loop body
LE: loop exit
PB: predicated region body
PF: predicated region fallthrough
CT: control target
= control target key end

     0   :  { %vm19_vm0 = vcmask 64512   ;;  %v543_v0 = vmov 0.0   ;;  %vm544_vm1 = vmmov 0   ;;  %s591_s1 = inlined_call_operand.vmem [shape: f32[8,128], index: 1, kind: input, shape index: {}]   ;;  %s592_s0 = inlined_call_operand.vmem [shape: f32[2,8], index: 0, kind: input, shape index: {}]   ;;  %s593_s2 = inlined_call_operand.vmem [shape: f32[1,128], index: 2, kind: input, shape index: {}]   ;;  %s594_s3 = inlined_call_operand.vmem [shape: f32[2,128], index: 3, kind: input, shape index: {}, may-alias: {3,4}]   ;;  %s595_s4 = inlined_call_operand.vmem [shape: f32[2,128], index: 4, kind: output, shape index: {}, may-alias: {3,4}]  }
   0x1   :  { %515 = vmatprep.subr.mxu0 %v543_v0  ;;  %v18_v1 = vld [vmem:[%s591_s1] sm:$0xff]  ;;  %517 = vmatprep.mubr.msk.f32.mxu0 %vm544_vm1, %v543_v0 }
   0x2   :  { %v17_v2 = vld [vmem:[%s592_s0] sm:$0x3]  ;;  %v24_v3 = vand.u32 4294901760, %v18_v1  ;;  %500 = vmatprep.subr.mxu1 %v543_v0  ;;  %502 = vmatprep.mubr.msk.f32.mxu1 %vm544_vm1, %v543_v0 }
   0x3   :  { %v21_v4 = vsel %vm19_vm0, %v17_v2, 0  ;;  %v487_v17 = vld [vmem:[%s593_s2] ss:$0 sm:$0xff] }
   0x4   :  { %v89_v5 = vand.u32 4294901760, %v21_v4  ;;  %v101_v6 = vsub.f32 %v18_v1, %v24_v3  ;;  %516 = vmatpush3.msra.mxu0 %v24_v3  ;;  %501 = vmatpush3.msra.mxu1 %v24_v3  ;;  %v479_v23 = vld [vmem:[%s594_s3] sm:$0x3] }
   0x5   :  { %505 = vmatprep.subr.mxu1 %v543_v0  ;;  %520 = vmatprep.subr.mxu0 %v543_v0 }
   0x6   :  { %v90_v7 = vsub.f32 %v21_v4, %v89_v5  ;;  %v102_v8 = vand.u32 4294901760, %v101_v6 }
   0x8   :  { %v91_v9 = vand.u32 4294901760, %v90_v7  ;;  %v103_v10 = vsub.f32 %v101_v6, %v102_v8 }
   0xa   :  { %518 = vmatmul.mubr.f32.vlgmr.msra.gmra.mrb[0].mxu0 %v91_v9  ;;  %v92_v11 = vsub.f32 %v90_v7, %v91_v9  ;;  %v104_v12 = vand.u32 4294901760, %v103_v10 }
   0xb   :  { %521 = vmatpush3.msra.mxu0 %v102_v8  ;;  %522 = vmatprep.mubr.msk.f32.mxu0 %vm544_vm1, %v543_v0 }
   0xc   :  { %v93_v13 = vand.u32 4294901760, %v92_v11  ;;  %525 = vmatprep.subr.mxu0 %v543_v0 }
   0xe   :  { %503 = vmatmul.mubr.f32.vlgmr.msra.gmra.mrb[0].mxu1 %v93_v13 }
   0xf   :  { %506 = vmatpush3.msra.mxu1 %v104_v12  ;;  %507 = vmatprep.mubr.msk.f32.mxu1 %vm544_vm1, %v543_v0 }
  0x10   :  { %510 = vmatprep.subr.mxu1 %v543_v0 }
  0x12   :  { %523 = vmatmul.mubr.f32.vlgmr.msra.gmra.mrb[0].mxu0 %v89_v5 }
  0x13   :  { %526 = vmatpush3.msra.mxu0 %v24_v3  ;;  %527 = vmatprep.mubr.msk.f32.mxu0 %vm544_vm1, %v543_v0 }
  0x16   :  { %508 = vmatmul.mubr.f32.vlgmr.msra.gmra.mrb[0].mxu1 %v89_v5 }
  0x17   :  { %511 = vmatpush3.msra.mxu1 %v101_v6  ;;  %512 = vmatprep.mubr.msk.f32.mxu1 %vm544_vm1, %v543_v0 }
  0x1a   :  { %528 = vmatmul.mubr.f32.vlgmr.msra.gmra.mrb[0].mxu0 %v89_v5 }
  0x1e   :  { %513 = vmatmul.mubr.f32.vlgmr.msra.gmra.mrb[0].mxu1 %v90_v7 }
  0xed   :  { %v465_v14 = vpop.f32.mrb[0].mxu0 }
  0xee   :  { %v529_v15 = vpop.f32.mrb[1].mxu0 }
  0xf1   :  { %v245_v16 = vpop.f32.mrb[0].mxu1 }
  0xf2   :  { %v530_v18 = vadd.f32 %v465_v14, %v245_v16  ;;  %v514_v19 = vpop.f32.mrb[1].mxu1 }
  0xf4   :  { %v476_v20 = vmul.f32 %v530_v18, %v487_v17 }
  0xf6   :  { %v477_v21 = vmul.f32 1.442695, %v476_v20 }
  0xf8   :  { %541 = vpow2.f32 %v477_v21 }
 0x102   :  { %v542_v22 = vpop.eup %541 }
 0x103   :  { %v480_v24 = vadd.f32 0.05, %v542_v22 }
 0x105   :  { %v481_v25 = vmul.f32 %v480_v24, %v479_v23 }
 0x107   :  { %482 = vst [vmem:[%s595_s4] sm:$0x3] %v481_v25 }

</bundles_post_ra>
